<compile_context>
chip_gen: v7x
topology: tpu7x:2x2x1
jax: 0.10.0
libtpu: 0.0.40
codegen_flags: <defaults>
</compile_context>

<pallas_src>
import jax
import jax.numpy as jnp
from jax.experimental import pallas as pl
from jax.experimental.pallas import tpu as pltpu


def _round_up(x, m):
    return (x + m - 1) // m * m


def _gated_attention_kernel(x_ref, w1_ref, b1_ref, wuv_ref, buv_ref,
                            wa_ref, ba_ref, h_ref, a_ref):
    x = x_ref[...].astype(jnp.float32)                               # (TN, E)

    # w1: Linear(E -> D) + ReLU
    h = jnp.dot(x, w1_ref[...], preferred_element_type=jnp.float32) + b1_ref[...]
    h = jnp.maximum(h, 0.0)                                          # (TN, D)

    # fused u_path|v_path: Linear(D -> 2P), one 2P-wide MXU pass
    uv = jnp.dot(h, wuv_ref[...], preferred_element_type=jnp.float32) + buv_ref[...]
    P = wuv_ref.shape[1] // 2
    u = jax.nn.sigmoid(uv[:, :P])                                    # (TN, P)
    v = jnp.tanh(uv[:, P:])                                          # (TN, P)

    # mc_ab: Linear(P -> C_pad) on the gated representation (lane-dense output)
    g = u * v                                                        # (TN, P)
    a = jnp.dot(g, wa_ref[...], preferred_element_type=jnp.float32) + ba_ref[...]

    h_ref[...] = h.astype(h_ref.dtype)
    a_ref[...] = a.astype(a_ref.dtype)


def gated_attention_backbone(x, params, *, tile_n=256):
    """x: (N, encoded_dim) float32. Returns (h, A) matching the PyTorch forward."""
    w1, b1, wu, bu, wv, bv, wa, ba = params
    N, E = x.shape
    D = w1.shape[1]           # input_dim_attention
    P = wu.shape[1]           # projection_dim_attention
    C = wa.shape[1]           # num_classes

    # Fuse the two gating projections into one 2P-wide RHS (fills wide MXU).
    wuv = jnp.concatenate([wu, wv], axis=1)                          # (D, 2P)
    buv = jnp.concatenate([bu, bv], axis=1)                          # (1, 2P)

    # Pad the class dim to a lane-dense multiple of 128 (zeros -> extra logits
    # are discarded by the final slice; math on real classes is unchanged).
    C_pad = max(128, _round_up(C, 128))
    wa_p = jnp.pad(wa, ((0, 0), (0, C_pad - C)))
    ba_p = jnp.pad(ba, ((0, 0), (0, C_pad - C)))

    # Row tiling: big tiles, but clamp so tiny bags don't over-pad.
    tile_n = max(8, min(tile_n, _round_up(N, 8)))
    N_pad = _round_up(N, tile_n)
    x_p = jnp.pad(x, ((0, N_pad - N), (0, 0))) if N_pad != N else x

    grid = (N_pad // tile_n,)
    full = lambda shape: pl.BlockSpec(shape, lambda i: (0, 0))       # whole-array weights

    h, a = pl.pallas_call(
        _gated_attention_kernel,
        out_shape=(
            jax.ShapeDtypeStruct((N_pad, D), x.dtype),      # h (post w1/ReLU)
            jax.ShapeDtypeStruct((N_pad, C_pad), x.dtype),  # attention logits (padded)
        ),
        grid=grid,
        in_specs=[
            pl.BlockSpec((tile_n, E), lambda i: (i, 0)),    # x row tile
            full((E, D)), full((1, D)),                     # w1, b1
            full((D, 2 * P)), full((1, 2 * P)),             # fused u|v weights
            full((P, C_pad)), full((1, C_pad)),             # mc_ab (lane-dense)
        ],
        out_specs=(
            pl.BlockSpec((tile_n, D), lambda i: (i, 0)),
            pl.BlockSpec((tile_n, C_pad), lambda i: (i, 0)),
        ),
        compiler_params=pltpu.CompilerParams(
            dimension_semantics=("parallel",)),
    )(x_p, w1, b1, wuv, buv, wa_p, ba_p)

    return h[:N], a[:N, :C]


def init_params(key, encoded_dim, input_dim, proj_dim, num_classes):
    """Deterministic synthetic parameters (Linear weights stored as (in, out))."""
    ks = jax.random.split(key, 8)
    def lin(kw, kb, fan_in, fan_out):
        scale = 1.0 / jnp.sqrt(fan_in)
        w = jax.random.uniform(kw, (fan_in, fan_out), jnp.float32, -scale, scale)
        b = jax.random.uniform(kb, (1, fan_out), jnp.float32, -scale, scale)
        return w, b
    w1, b1 = lin(ks[0], ks[1], encoded_dim, input_dim)
    wu, bu = lin(ks[2], ks[3], input_dim, proj_dim)
    wv, bv = lin(ks[4], ks[5], input_dim, proj_dim)
    wa, ba = lin(ks[6], ks[7], proj_dim, num_classes)
    return (w1, b1, wu, bu, wv, bv, wa, ba)


def reference_forward(x, params):
    w1, b1, wu, bu, wv, bv, wa, ba = params
    h = jnp.maximum(x @ w1 + b1, 0.0)
    u = jax.nn.sigmoid(h @ wu + bu)
    v = jnp.tanh(h @ wv + bv)
    a = (u * v) @ wa + ba
    return h, a


if __name__ == "__main__":
    # Small shapes consistent with the module (encoded -> attention -> projection -> classes)
    ENCODED_DIM = 256
    INPUT_DIM = 128
    PROJ_DIM = 128
    NUM_CLASSES = 2

    key = jax.random.PRNGKey(0)
    kx, kp, kx2 = jax.random.split(key, 3)
    params = init_params(kp, ENCODED_DIM, INPUT_DIM, PROJ_DIM, NUM_CLASSES)

    # Case 1: tiny bag (tile clamps, single grid step).
    N1 = 16
    x1 = jax.random.normal(kx, (N1, ENCODED_DIM), jnp.float32)
    h1, a1 = jax.block_until_ready(gated_attention_backbone(x1, params))
    h1_ref, a1_ref = reference_forward(x1, params)
    assert h1.shape == (N1, INPUT_DIM) and a1.shape == (N1, NUM_CLASSES)
    assert jnp.allclose(h1, h1_ref, atol=1e-4, rtol=1e-4)
    assert jnp.allclose(a1, a1_ref, atol=1e-4, rtol=1e-4)

    # Case 2: ragged bag (exercises N padding + multi-step parallel grid).
    N2 = 300
    x2 = jax.random.normal(kx2, (N2, ENCODED_DIM), jnp.float32)
    h2, a2 = jax.block_until_ready(gated_attention_backbone(x2, params, tile_n=256))
    h2_ref, a2_ref = reference_forward(x2, params)
    assert h2.shape == (N2, INPUT_DIM) and a2.shape == (N2, NUM_CLASSES)
    assert jnp.allclose(h2, h2_ref, atol=1e-4, rtol=1e-4)
    assert jnp.allclose(a2, a2_ref, atol=1e-4, rtol=1e-4)

    print("KERNEL_OK")
</pallas_src>

<mosaic_0001>
module attributes {stable_mosaic.version = 11 : i64} {
  func.func @_gated_attention_kernel(%arg0: i32, %arg1: memref<16x256xf32, #tpu.memory_space<vmem>>, %arg2: memref<256x128xf32, #tpu.memory_space<vmem>>, %arg3: memref<1x128xf32, #tpu.memory_space<vmem>>, %arg4: memref<128x256xf32, #tpu.memory_space<vmem>>, %arg5: memref<1x256xf32, #tpu.memory_space<vmem>>, %arg6: memref<128x128xf32, #tpu.memory_space<vmem>>, %arg7: memref<1x128xf32, #tpu.memory_space<vmem>>, %arg8: memref<16x128xf32, #tpu.memory_space<vmem>>, %arg9: memref<16x128xf32, #tpu.memory_space<vmem>>) attributes {dimension_semantics = [#tpu.dimension_semantics<parallel>], iteration_bounds = array<i64: 1>, scalar_prefetch = 0 : i64, scratch_operands = 0 : i64, tpu.core_type = #tpu.core_type<tc>, window_params = [{transform_indices = @transform_0, window_bounds = array<i64: 16, 256>}, {pipeline_mode = #tpu.pipeline_mode<synchronous>, transform_indices = @transform_1, window_bounds = array<i64: 256, 128>}, {pipeline_mode = #tpu.pipeline_mode<synchronous>, transform_indices = @transform_2, window_bounds = array<i64: 1, 128>}, {pipeline_mode = #tpu.pipeline_mode<synchronous>, transform_indices = @transform_3, window_bounds = array<i64: 128, 256>}, {pipeline_mode = #tpu.pipeline_mode<synchronous>, transform_indices = @transform_4, window_bounds = array<i64: 1, 256>}, {pipeline_mode = #tpu.pipeline_mode<synchronous>, transform_indices = @transform_5, window_bounds = array<i64: 128, 128>}, {pipeline_mode = #tpu.pipeline_mode<synchronous>, transform_indices = @transform_6, window_bounds = array<i64: 1, 128>}, {transform_indices = @transform_7, window_bounds = array<i64: 16, 128>}, {transform_indices = @transform_8, window_bounds = array<i64: 16, 128>}]} {
    %c0 = arith.constant 0 : index
    %c0_0 = arith.constant 0 : index
    %0 = vector.load %arg1[%c0, %c0_0] : memref<16x256xf32, #tpu.memory_space<vmem>>, vector<16x256xf32>
    %c0_1 = arith.constant 0 : index
    %c0_2 = arith.constant 0 : index
    %1 = vector.load %arg2[%c0_1, %c0_2] : memref<256x128xf32, #tpu.memory_space<vmem>>, vector<256x128xf32>
    %cst = arith.constant dense<0.000000e+00> : vector<16x128xf32>
    %2 = tpu.matmul %0, %1, %cst {dimension_numbers = #tpu.dot_dimension_numbers<[1], [0], [0], [1], [0, 0, 1, 1], [], []>} : vector<16x256xf32>, vector<256x128xf32>, vector<16x128xf32> -> vector<16x128xf32>
    %c0_3 = arith.constant 0 : index
    %c0_4 = arith.constant 0 : index
    %3 = vector.load %arg3[%c0_3, %c0_4] : memref<1x128xf32, #tpu.memory_space<vmem>>, vector<1x128xf32>
    %4 = vector.broadcast %3 : vector<1x128xf32> to vector<16x128xf32>
    %5 = arith.addf %2, %4 : vector<16x128xf32>
    %cst_5 = arith.constant 0.000000e+00 : f32
    %6 = vector.broadcast %cst_5 : f32 to vector<16x128xf32>
    %7 = arith.maximumf %5, %6 : vector<16x128xf32>
    %c0_6 = arith.constant 0 : index
    %c0_7 = arith.constant 0 : index
    %8 = vector.load %arg4[%c0_6, %c0_7] : memref<128x256xf32, #tpu.memory_space<vmem>>, vector<128x256xf32>
    %cst_8 = arith.constant dense<0.000000e+00> : vector<16x256xf32>
    %9 = tpu.matmul %7, %8, %cst_8 {dimension_numbers = #tpu.dot_dimension_numbers<[1], [0], [0], [1], [0, 0, 1, 1], [], []>} : vector<16x128xf32>, vector<128x256xf32>, vector<16x256xf32> -> vector<16x256xf32>
    %c0_9 = arith.constant 0 : index
    %c0_10 = arith.constant 0 : index
    %10 = vector.load %arg5[%c0_9, %c0_10] : memref<1x256xf32, #tpu.memory_space<vmem>>, vector<1x256xf32>
    %11 = vector.broadcast %10 : vector<1x256xf32> to vector<16x256xf32>
    %12 = arith.addf %9, %11 : vector<16x256xf32>
    %13 = vector.extract_strided_slice %12 {offsets = [0, 0], sizes = [16, 128], strides = [1, 1]} : vector<16x256xf32> to vector<16x128xf32>
    %14 = arith.negf %13 : vector<16x128xf32>
    %15 = math.exp %14 : vector<16x128xf32>
    %cst_11 = arith.constant 1.000000e+00 : f32
    %16 = vector.broadcast %cst_11 : f32 to vector<16x128xf32>
    %17 = arith.addf %16, %15 : vector<16x128xf32>
    %18 = arith.divf %16, %17 : vector<16x128xf32>
    %19 = vector.extract_strided_slice %12 {offsets = [0, 128], sizes = [16, 128], strides = [1, 1]} : vector<16x256xf32> to vector<16x128xf32>
    %20 = math.tanh %19 : vector<16x128xf32>
    %21 = arith.mulf %18, %20 : vector<16x128xf32>
    %c0_12 = arith.constant 0 : index
    %c0_13 = arith.constant 0 : index
    %22 = vector.load %arg6[%c0_12, %c0_13] : memref<128x128xf32, #tpu.memory_space<vmem>>, vector<128x128xf32>
    %cst_14 = arith.constant dense<0.000000e+00> : vector<16x128xf32>
    %23 = tpu.matmul %21, %22, %cst_14 {dimension_numbers = #tpu.dot_dimension_numbers<[1], [0], [0], [1], [0, 0, 1, 1], [], []>} : vector<16x128xf32>, vector<128x128xf32>, vector<16x128xf32> -> vector<16x128xf32>
    %c0_15 = arith.constant 0 : index
    %c0_16 = arith.constant 0 : index
    %24 = vector.load %arg7[%c0_15, %c0_16] : memref<1x128xf32, #tpu.memory_space<vmem>>, vector<1x128xf32>
    %25 = vector.broadcast %24 : vector<1x128xf32> to vector<16x128xf32>
    %26 = arith.addf %23, %25 : vector<16x128xf32>
    %c0_17 = arith.constant 0 : index
    %c0_18 = arith.constant 0 : index
    %27 = vector.load %arg8[%c0_17, %c0_18] : memref<16x128xf32, #tpu.memory_space<vmem>>, vector<16x128xf32>
    tpu.vector_store %arg8[%c0_17, %c0_18], %7 {strides = array<i32>} : memref<16x128xf32, #tpu.memory_space<vmem>>, vector<16x128xf32>,
    %c0_19 = arith.constant 0 : index
    %c0_20 = arith.constant 0 : index
    %28 = vector.load %arg9[%c0_19, %c0_20] : memref<16x128xf32, #tpu.memory_space<vmem>>, vector<16x128xf32>
    tpu.vector_store %arg9[%c0_19, %c0_20], %26 {strides = array<i32>} : memref<16x128xf32, #tpu.memory_space<vmem>>, vector<16x128xf32>,
    return
  }
  func.func @transform_0(%arg0: i32) -> (i32, i32) {
    %c0_i32 = arith.constant 0 : i32
    %c0_i32_0 = arith.constant 0 : i32
    return %arg0, %c0_i32 : i32, i32
  }
  func.func @transform_1(%arg0: i32) -> (i32, i32) {
    %c0_i32 = arith.constant 0 : i32
    %c0_i32_0 = arith.constant 0 : i32
    %c0_i32_1 = arith.constant 0 : i32
    return %c0_i32, %c0_i32_0 : i32, i32
  }
  func.func @transform_2(%arg0: i32) -> (i32, i32) {
    %c0_i32 = arith.constant 0 : i32
    %c0_i32_0 = arith.constant 0 : i32
    %c0_i32_1 = arith.constant 0 : i32
    return %c0_i32, %c0_i32_0 : i32, i32
  }
  func.func @transform_3(%arg0: i32) -> (i32, i32) {
    %c0_i32 = arith.constant 0 : i32
    %c0_i32_0 = arith.constant 0 : i32
    %c0_i32_1 = arith.constant 0 : i32
    return %c0_i32, %c0_i32_0 : i32, i32
  }
  func.func @transform_4(%arg0: i32) -> (i32, i32) {
    %c0_i32 = arith.constant 0 : i32
    %c0_i32_0 = arith.constant 0 : i32
    %c0_i32_1 = arith.constant 0 : i32
    return %c0_i32, %c0_i32_0 : i32, i32
  }
  func.func @transform_5(%arg0: i32) -> (i32, i32) {
    %c0_i32 = arith.constant 0 : i32
    %c0_i32_0 = arith.constant 0 : i32
    %c0_i32_1 = arith.constant 0 : i32
    return %c0_i32, %c0_i32_0 : i32, i32
  }
  func.func @transform_6(%arg0: i32) -> (i32, i32) {
    %c0_i32 = arith.constant 0 : i32
    %c0_i32_0 = arith.constant 0 : i32
    %c0_i32_1 = arith.constant 0 : i32
    return %c0_i32, %c0_i32_0 : i32, i32
  }
  func.func @transform_7(%arg0: i32) -> (i32, i32) {
    %c0_i32 = arith.constant 0 : i32
    %c0_i32_0 = arith.constant 0 : i32
    return %arg0, %c0_i32 : i32, i32
  }
  func.func @transform_8(%arg0: i32) -> (i32, i32) {
    %c0_i32 = arith.constant 0 : i32
    %c0_i32_0 = arith.constant 0 : i32
    return %arg0, %c0_i32 : i32, i32
  }
}

</mosaic_0001>

<bundles_post_ra>
// kernel: tpu_custom_call.1
= control target key start
LH: loop header
LB: loop body
LE: loop exit
PB: predicated region body
PF: predicated region fallthrough
CT: control target
= control target key end

     0   :  { %14 = vsyncpa [#allocation3], 0  ;;  %s991_s0 = inlined_call_operand.hbm [shape: f32[16,256], index: 0, kind: input, shape index: {}]   ;;  %s992_s1 = inlined_call_operand.hbm [shape: f32[256,128], index: 1, kind: input, shape index: {}]   ;;  %s993_s2 = inlined_call_operand.vmem [shape: f32[1,128], index: 2, kind: input, shape index: {}]   ;;  %s994_s3 = inlined_call_operand.hbm [shape: f32[128,256], index: 3, kind: input, shape index: {}]   ;;  %s995_s4 = inlined_call_operand.vmem [shape: f32[1,256], index: 4, kind: input, shape index: {}]   ;;  %s996_s5 = inlined_call_operand.hbm [shape: f32[128,128], index: 5, kind: input, shape index: {}]   ;;  %s997_s6 = inlined_call_operand.vmem [shape: f32[1,128], index: 6, kind: input, shape index: {}]   ;;  %s998_s7 = inlined_call_operand.hbm [shape: f32[16,128], index: 7, kind: output, shape index: {0}]   ;;  %s999_s8 = inlined_call_operand.hbm [shape: f32[16,128], index: 8, kind: output, shape index: {1}]  }
   0x1   :  { %15 = vsyncpa [#allocation6], 0 }
   0x2   :  { %16 = vsyncpa [#allocation9], 0 }
   0x3   :  { %17 = vsyncpa [#allocation4], 0 }
   0x4   :  { %18 = vsyncpa [#allocation12], 0  ;;  %s835_s27 = smov [#allocation5]   ;;  %s693_s9 = scalar_lea.hbm %s992_s1, 4096 }
   0x5   :  { %s36_s28 = sshll.u32 %s835_s27, 4  ;;  %p694_p0 = scmp.ne.s32.totalorder %s992_s1, %s693_s9  ;;  %s37_s28 = int_to_ptr.vmem [resolvable:$true] %s36_s28 }
   0x6   :  { %p697_p1 = scmp.lt.u32.totalorder %s693_s9, %s992_s1 }
   0x8   :  { %p699_p2 = pnand %p697_p1, %p694_p0 }
   0xa   :  { %702 = shalt.err (!%p699_p2)
}
   0xb   :  { %s703_s14 = scalar_lea.vmem %s37_s28, 4096  ;;  %p708_p4 = scmp.lt.s32.totalorder %s37_s28, %s37_s28 }
   0xc   :  { %p704_p3 = scmp.ne.s32.totalorder %s37_s28, %s703_s14  ;;  %p709_p5 = scmp.lt.s32.totalorder %s703_s14, %s703_s14 }
   0xe   :  { %p710_p6 = por %p709_p5, %p708_p4 }
  0x10   :  { %p711_p7 = pnand %p710_p6, %p704_p3 }
  0x12   :  { %714 = shalt.err (!%p711_p7)
}
  0x13   :  { %s836_s15 = smov 128   ;;  %s837_s16 = smov 8  }
  0x14   :  { %42 = dma.hbm_to_vmem [thread:$0]  %s992_s1, 4096, %s37_s28, [#allocation6], %s836_s15, %s836_s15, %s837_s16  }
  0x15   :  { %s838_s19 = smov [#allocation2]   ;;  %s715_s23 = scalar_lea.hbm %s991_s0, 512 }
  0x16   :  { %s24_s20 = sshll.u32 %s838_s19, 4  ;;  %p716_p8 = scmp.ne.s32.totalorder %s991_s0, %s715_s23  ;;  %s25_s20 = int_to_ptr.vmem [resolvable:$true] %s24_s20 }
  0x17   :  { %p719_p9 = scmp.lt.u32.totalorder %s715_s23, %s991_s0 }
  0x19   :  { %p721_p10 = pnand %p719_p9, %p716_p8 }
  0x1b   :  { %724 = shalt.err (!%p721_p10)
}
  0x1c   :  { %s725_s29 = scalar_lea.vmem %s25_s20, 512  ;;  %p730_p12 = scmp.lt.s32.totalorder %s25_s20, %s25_s20 }
  0x1d   :  { %p726_p11 = scmp.ne.s32.totalorder %s25_s20, %s725_s29  ;;  %p731_p13 = scmp.lt.s32.totalorder %s725_s29, %s725_s29 }
  0x1f   :  { %p732_p0 = por %p731_p13, %p730_p12 }
  0x21   :  { %p733_p1 = pnand %p732_p0, %p726_p11 }
  0x23   :  { %736 = shalt.err (!%p733_p1)
}
  0x24   :  { %s839_s1 = smov 256   ;;  %s840_s28 = smov 16  }
  0x25   :  { %30 = dma.hbm_to_vmem [thread:$0]  %s991_s0, 512, %s25_s20, [#allocation3], %s839_s1, %s839_s1, %s840_s28  }
  0x26   :  { %s841_s10 = smov [#allocation7]   ;;  %s842_s12 = smov [#allocation8]  }
  0x27   :  { %s50_s11 = sshll.u32 %s841_s10, 4  ;;  %s64_s13 = sshll.u32 %s842_s12, 4  ;;  %s51_s11 = int_to_ptr.vmem [resolvable:$true] %s50_s11  ;;  %s918_s13 = int_to_ptr.vmem [resolvable:$true] %s64_s13 }
  0x28   :  { %s737_s18 = scalar_lea.hbm %s994_s3, 4096 }
  0x29   :  { %p738_p2 = scmp.ne.s32.totalorder %s994_s3, %s737_s18  ;;  %p741_p3 = scmp.lt.u32.totalorder %s737_s18, %s994_s3 }
  0x2b   :  { %p743_p4 = pnand %p741_p3, %p738_p2 }
  0x2d   :  { %746 = shalt.err (!%p743_p4)
}
  0x2e   :  { %s747_s0 = scalar_lea.vmem %s51_s11, 4096  ;;  %p752_p6 = scmp.lt.s32.totalorder %s51_s11, %s51_s11 }
  0x2f   :  { %p748_p5 = scmp.ne.s32.totalorder %s51_s11, %s747_s0  ;;  %p753_p7 = scmp.lt.s32.totalorder %s747_s0, %s747_s0 }
  0x31   :  { %p754_p8 = por %p753_p7, %p752_p6 }
  0x33   :  { %p755_p9 = pnand %p754_p8, %p748_p5 }
  0x35   :  { %758 = shalt.err (!%p755_p9)
}
  0x36   :  { %56 = dma.hbm_to_vmem [thread:$0]  %s994_s3, 4096, %s51_s11, [#allocation6], %s839_s1, %s839_s1, %s840_s28  }
  0x37   :  { %s759_s27 = scalar_lea.hbm %s996_s5, 2048 }
  0x38   :  { %p760_p10 = scmp.ne.s32.totalorder %s996_s5, %s759_s27  ;;  %p763_p11 = scmp.lt.u32.totalorder %s759_s27, %s996_s5 }
  0x3a   :  { %p765_p12 = pnand %p763_p11, %p760_p10 }
  0x3c   :  { %768 = shalt.err (!%p765_p12)
}
  0x3d   :  { %s769_s12 = scalar_lea.vmem %s918_s13, 2048  ;;  %p774_p0 = scmp.lt.s32.totalorder %s918_s13, %s918_s13 }
  0x3e   :  { %p770_p13 = scmp.ne.s32.totalorder %s918_s13, %s769_s12  ;;  %p775_p1 = scmp.lt.s32.totalorder %s769_s12, %s769_s12 }
  0x40   :  { %p776_p2 = por %p775_p1, %p774_p0 }
  0x42   :  { %p777_p3 = pnand %p776_p2, %p770_p13 }
  0x44   :  { %780 = shalt.err (!%p777_p3)
}
  0x45   :  { %70 = dma.hbm_to_vmem [thread:$0]  %s996_s5, 2048, %s918_s13, [#allocation9], %s836_s15, %s836_s15, %s837_s16  }
  0x46   :  { %825 = dma.done.wait [#allocation3], 512  }
  0x47   :  { %826 = vsyncadd [#allocation3], 4294966784 }
  0x48   :  { %827 = dma.done.wait [#allocation6], 8192  }
  0x49   :  { %828 = vsyncadd [#allocation6], 4294959104 }
  0x4a   :  { %829 = dma.done.wait [#allocation9], 2048  }
  0x4b   :  { %830 = vsyncadd [#allocation9], 4294965248  ;;  %v105_v0 = vld [vmem:[#allocation5 + $0x80] sm:$0xff]  ;;  %v106_v1 = vld [vmem:[#allocation5 + $0x88] sm:$0xff] }
  0x4c   :  { %v89_v2 = vld [vmem:[#allocation5] sm:$0xff]  ;;  %v574_v3 = vpack.c.bf16 %v106_v1, %v105_v0  ;;  %v90_v4 = vld [vmem:[#allocation5 + $0x8] sm:$0xff]  ;;  %v107_v5 = vld [vmem:[#allocation5 + $0x90] sm:$0xff] }
  0x4d   :  { %v108_v6 = vld [vmem:[#allocation5 + $0x98] sm:$0xff]  ;;  %v576_v7 = vpack.c.bf16 %v90_v4, %v89_v2  ;;  %v91_v9 = vld [vmem:[#allocation5 + $0x10] sm:$0xff]  ;;  %v109_v11 = vld [vmem:[#allocation5 + $0xa0] sm:$0xff] }
  0x4e   :  { %v578_v8 = vpack.c.bf16 %v108_v6, %v107_v5  ;;  %v92_v10 = vld [vmem:[#allocation5 + $0x18] sm:$0xff]  ;;  %575 = vmatprep.subr.bf16.mxu0 %v574_v3  ;;  %v110_v12 = vld [vmem:[#allocation5 + $0xa8] sm:$0xff]  ;;  %v93_v15 = vld [vmem:[#allocation5 + $0x20] sm:$0xff] }
  0x4f   :  { %577 = vmatpush3.bf16.msra.mxu0 %v576_v7  ;;  %v580_v13 = vpack.c.bf16 %v92_v10, %v91_v9  ;;  %v582_v14 = vpack.c.bf16 %v110_v12, %v109_v11  ;;  %v94_v16 = vld [vmem:[#allocation5 + $0x28] sm:$0xff]  ;;  %v111_v17 = vld [vmem:[#allocation5 + $0xb0] sm:$0xff]  ;;  %v112_v18 = vld [vmem:[#allocation5 + $0xb8] sm:$0xff] }
  0x50   :  { %579 = vmatprep.subr.bf16.mxu0 %v578_v8  ;;  %v584_v19 = vpack.c.bf16 %v94_v16, %v93_v15  ;;  %v586_v20 = vpack.c.bf16 %v112_v18, %v111_v17  ;;  %v95_v21 = vld [vmem:[#allocation5 + $0x30] sm:$0xff]  ;;  %v96_v22 = vld [vmem:[#allocation5 + $0x38] sm:$0xff]  ;;  %v113_v23 = vld [vmem:[#allocation5 + $0xc0] sm:$0xff] }
  0x51   :  { %v114_v24 = vld [vmem:[#allocation5 + $0xc8] sm:$0xff]  ;;  %v97_v26 = vld [vmem:[#allocation5 + $0x40] sm:$0xff]  ;;  %v588_v28 = vpack.c.bf16 %v96_v22, %v95_v21  ;;  %v115_v29 = vld [vmem:[#allocation5 + $0xd0] sm:$0xff] }
  0x52   :  { %v86_v25 = vld [vmem:[#allocation2 + $0x8] sm:$0xff]  ;;  %v116_v30 = vld [vmem:[#allocation5 + $0xd8] sm:$0xff]  ;;  %v205_v33 = vld [vmem:[#allocation7] sm:$0xff]  ;;  %v590_v34 = vpack.c.bf16 %v114_v24, %v113_v23 }
  0x53   :  { %581 = vmatpush3.bf16.msra.mxu0 %v580_v13  ;;  %v98_v27 = vld [vmem:[#allocation5 + $0x48] sm:$0xff]  ;;  %192 = vmatprep.mubr.f32.mxu0 %v86_v25  ;;  %v208_v32 = vld [vmem:[#allocation7 + $0x18] sm:$0xff]  ;;  %v207_v36 = vld [vmem:[#allocation7 + $0x10] sm:$0xff]  ;;  %v594_v49 = vpack.c.bf16 %v116_v30, %v115_v29 }
  0x54   :  { %583 = vmatprep.subr.bf16.mxu0 %v582_v14  ;;  %v206_v31 = vld [vmem:[#allocation7 + $0x8] sm:$0xff]  ;;  %v212_v38 = vld [vmem:[#allocation7 + $0x38] sm:$0xff]  ;;  %v608_v39 = vpack.c.bf16 %v207_v36, %v205_v33  ;;  %v209_v41 = vld [vmem:[#allocation7 + $0x20] sm:$0xff]  ;;  %v592_v45 = vpack.c.bf16 %v98_v27, %v97_v26  ;;  %v843_v36 = vmov 0.0  }
  0x55   :  { %v606_v35 = vpack.c.bf16 %v208_v32, %v206_v31  ;;  %v210_v37 = vld [vmem:[#allocation7 + $0x28] sm:$0xff]  ;;  %v211_v42 = vld [vmem:[#allocation7 + $0x30] sm:$0xff]  ;;  %v216_v44 = vld [vmem:[#allocation7 + $0x58] sm:$0xff]  ;;  %313 = vmatprep.mubr.f32.mxu1 %v843_v36 }
  0x56   :  { %v610_v40 = vpack.c.bf16 %v212_v38, %v210_v37  ;;  %v214_v43 = vld [vmem:[#allocation7 + $0x48] sm:$0xff]  ;;  %v99_v46 = vld [vmem:[#allocation5 + $0x50] sm:$0xff]  ;;  %v100_v47 = vld [vmem:[#allocation5 + $0x58] sm:$0xff]  ;;  %v612_v48 = vpack.c.bf16 %v211_v42, %v209_v41 }
  0x57   :  { %585 = vmatpush3.bf16.msra.mxu0 %v584_v19  ;;  %607 = vmatprep.subr.bf16.mxu1 %v606_v35  ;;  %v117_v50 = vld [vmem:[#allocation5 + $0xe0] sm:$0xff]  ;;  %v614_v51 = vpack.c.bf16 %v216_v44, %v214_v43  ;;  %v215_v53 = vld [vmem:[#allocation7 + $0x50] sm:$0xff]  ;;  %v118_v54 = vld [vmem:[#allocation5 + $0xe8] sm:$0xff]  ;;  %v596_v57 = vpack.c.bf16 %v100_v47, %v99_v46 }
  0x58   :  { %587 = vmatprep.subr.bf16.mxu0 %v586_v20  ;;  %609 = vmatpush1.bf16.msra.mxu1 %v608_v39  ;;  %v213_v52 = vld [vmem:[#allocation7 + $0x40] sm:$0xff]  ;;  %v218_v55 = vld [vmem:[#allocation7 + $0x68] sm:$0xff]  ;;  %v220_v56 = vld [vmem:[#allocation7 + $0x78] sm:$0xff]  ;;  %v598_v61 = vpack.c.bf16 %v118_v54, %v117_v50 }
  0x59   :  { %611 = vmatprep.subr.bf16.mxu1 %v610_v40  ;;  %v101_v58 = vld [vmem:[#allocation5 + $0x60] sm:$0xff]  ;;  %v102_v59 = vld [vmem:[#allocation5 + $0x68] sm:$0xff]  ;;  %v616_v60 = vpack.c.bf16 %v215_v53, %v213_v52  ;;  %v119_v62 = vld [vmem:[#allocation5 + $0xf0] sm:$0xff]  ;;  %v618_v63 = vpack.c.bf16 %v220_v56, %v218_v55 }
  0x5a   :  { %v217_v0 = vld [vmem:[#allocation7 + $0x60] sm:$0xff]  ;;  %v219_v1 = vld [vmem:[#allocation7 + $0x70] sm:$0xff]  ;;  %v120_v2 = vld [vmem:[#allocation5 + $0xf8] sm:$0xff]  ;;  %v600_v5 = vpack.c.bf16 %v102_v59, %v101_v58 }
  0x5b   :  { %589 = vmatpush3.bf16.msra.mxu0 %v588_v28  ;;  %v222_v3 = vld [vmem:[#allocation7 + $0x88] sm:$0xff]  ;;  %v224_v4 = vld [vmem:[#allocation7 + $0x98] sm:$0xff]  ;;  %v103_v6 = vld [vmem:[#allocation5 + $0x70] sm:$0xff]  ;;  %v620_v7 = vpack.c.bf16 %v219_v1, %v217_v0  ;;  %v602_v8 = vpack.c.bf16 %v120_v2, %v119_v62 }
  0x5c   :  { %591 = vmatprep.subr.bf16.mxu0 %v590_v34  ;;  %613 = vmatpush1.bf16.msra.mxu1 %v612_v48  ;;  %v104_v9 = vld [vmem:[#allocation5 + $0x78] sm:$0xff]  ;;  %v622_v10 = vpack.c.bf16 %v224_v4, %v222_v3  ;;  %v221_v11 = vld [vmem:[#allocation7 + $0x80] sm:$0xff]  ;;  %v223_v12 = vld [vmem:[#allocation7 + $0x90] sm:$0xff] }
  0x5d   :  { %615 = vmatprep.subr.bf16.mxu1 %v614_v51  ;;  %v226_v13 = vld [vmem:[#allocation7 + $0xa8] sm:$0xff]  ;;  %v228_v14 = vld [vmem:[#allocation7 + $0xb8] sm:$0xff]  ;;  %v604_v15 = vpack.c.bf16 %v104_v9, %v103_v6  ;;  %v624_v16 = vpack.c.bf16 %v223_v12, %v221_v11  ;;  %v225_v18 = vld [vmem:[#allocation7 + $0xa0] sm:$0xff] }
  0x5e   :  { %v626_v17 = vpack.c.bf16 %v228_v14, %v226_v13  ;;  %v227_v19 = vld [vmem:[#allocation7 + $0xb0] sm:$0xff]  ;;  %v85_v20 = vld [vmem:[#allocation2] sm:$0xff]  ;;  %v88_v22 = vld [vmem:[#allocation2 + $0x18] sm:$0xff] }
  0x5f   :  { %593 = vmatpush3.bf16.msra.mxu0 %v592_v45  ;;  %v628_v21 = vpack.c.bf16 %v227_v19, %v225_v18  ;;  %v87_v23 = vld [vmem:[#allocation2 + $0x10] sm:$0xff]  ;;  %v230_v24 = vld [vmem:[#allocation7 + $0xc8] sm:$0xff]  ;;  %v232_v25 = vld [vmem:[#allocation7 + $0xd8] sm:$0xff] }
  0x60   :  { %595 = vmatprep.subr.bf16.mxu0 %v594_v49  ;;  %617 = vmatpush1.bf16.msra.mxu1 %v616_v60  ;;  %v630_v26 = vpack.c.bf16 %v232_v25, %v230_v24  ;;  %v229_v27 = vld [vmem:[#allocation7 + $0xc0] sm:$0xff]  ;;  %v231_v28 = vld [vmem:[#allocation7 + $0xd0] sm:$0xff]  ;;  %v234_v30 = vld [vmem:[#allocation7 + $0xe8] sm:$0xff] }
  0x61   :  { %619 = vmatprep.subr.bf16.mxu1 %v618_v63  ;;  %v632_v29 = vpack.c.bf16 %v231_v28, %v229_v27  ;;  %v236_v31 = vld [vmem:[#allocation7 + $0xf8] sm:$0xff]  ;;  %v233_v33 = vld [vmem:[#allocation7 + $0xe0] sm:$0xff]  ;;  %v235_v34 = vld [vmem:[#allocation7 + $0xf0] sm:$0xff] }
  0x62   :  { %v634_v32 = vpack.c.bf16 %v236_v31, %v234_v30  ;;  %v636_v35 = vpack.c.bf16 %v235_v34, %v233_v33  ;;  %v479_v38 = vld [vmem:[%s993_s2] ss:$0 sm:$0xff]  ;;  %v343_v49 = vld [vmem:[#allocation8 + $0x8] sm:$0xff]  ;;  %v344_v51 = vld [vmem:[#allocation8 + $0x10] sm:$0xff] }
  0x63   :  { %597 = vmatpush3.bf16.msra.mxu0 %v596_v57  ;;  %v342_v48 = vld [vmem:[#allocation8] sm:$0xff]  ;;  %v345_v52 = vld [vmem:[#allocation8 + $0x18] sm:$0xff]  ;;  %v347_v55 = vld [vmem:[#allocation8 + $0x28] sm:$0xff] }
  0x64   :  { %599 = vmatprep.subr.bf16.mxu0 %v598_v61  ;;  %621 = vmatpush1.bf16.msra.mxu1 %v620_v7  ;;  %v638_v50 = vpack.c.bf16 %v343_v49, %v342_v48  ;;  %v642_v53 = vpack.c.bf16 %v345_v52, %v344_v51  ;;  %v346_v54 = vld [vmem:[#allocation8 + $0x20] sm:$0xff]  ;;  %v348_v57 = vld [vmem:[#allocation8 + $0x30] sm:$0xff]  ;;  %v349_v58 = vld [vmem:[#allocation8 + $0x38] sm:$0xff] }
  0x65   :  { %623 = vmatprep.subr.bf16.mxu1 %v622_v10  ;;  %v646_v56 = vpack.c.bf16 %v347_v55, %v346_v54  ;;  %v650_v59 = vpack.c.bf16 %v349_v58, %v348_v57  ;;  %v350_v60 = vld [vmem:[#allocation8 + $0x40] sm:$0xff]  ;;  %v351_v61 = vld [vmem:[#allocation8 + $0x48] sm:$0xff]  ;;  %v352_v63 = vld [vmem:[#allocation8 + $0x50] sm:$0xff] }
  0x66   :  { %v654_v62 = vpack.c.bf16 %v351_v61, %v350_v60  ;;  %v353_v0 = vld [vmem:[#allocation8 + $0x58] sm:$0xff]  ;;  %v354_v2 = vld [vmem:[#allocation8 + $0x60] sm:$0xff]  ;;  %v355_v3 = vld [vmem:[#allocation8 + $0x68] sm:$0xff] }
  0x67   :  { %601 = vmatpush3.bf16.msra.mxu0 %v600_v5  ;;  %v658_v1 = vpack.c.bf16 %v353_v0, %v352_v63  ;;  %v356_v4 = vld [vmem:[#allocation8 + $0x70] sm:$0xff]  ;;  %v662_v5 = vpack.c.bf16 %v355_v3, %v354_v2  ;;  %v357_v6 = vld [vmem:[#allocation8 + $0x78] sm:$0xff]  ;;  %v237_v11 = vld [vmem:[%s995_s4] sm:$0x3]  ;;  %s844_s4 = smov [#allocation10]  }
  0x68   :  { %603 = vmatprep.subr.bf16.mxu0 %v602_v8  ;;  %625 = vmatpush1.bf16.msra.mxu1 %v624_v16  ;;  %v666_v7 = vpack.c.bf16 %v357_v6, %v356_v4  ;;  %v239_v8 = vlaneseq  ;;  %s449_s13 = sshll.u32 %s844_s4, 4  ;;  %s450_s13 = int_to_ptr.vmem [resolvable:$true] %s449_s13 }
  0x69   :  { %627 = vmatprep.subr.bf16.mxu1 %v626_v17  ;;  %s781_s14 = scalar_lea.vmem %s450_s13, 256  ;;  %p786_p5 = scmp.lt.s32.totalorder %s450_s13, %s450_s13 }
  0x6a   :  { %v240_v9 = vshrl.u32 %v239_v8, 7  ;;  %p782_p4 = scmp.ne.s32.totalorder %s450_s13, %s781_s14  ;;  %p787_p6 = scmp.lt.s32.totalorder %s781_s14, %s781_s14 }
  0x6b   :  { %605 = vmatpush3.bf16.msra.mxu0 %v604_v15 }
  0x6c   :  { %629 = vmatpush1.bf16.msra.mxu1 %v628_v21  ;;  %639 = vmatprep.subr.bf16.mxu0 %v638_v50  ;;  %v241_v10 = vsub.s32 0, %v240_v9  ;;  %v245_v18 = vsub.s32 1, %v240_v9  ;;  %p788_p7 = por %p787_p6, %p786_p5 }
  0x6d   :  { %631 = vmatprep.subr.bf16.mxu1 %v630_v26 }
  0x6e   :  { %193 = vmatmul.mubr.f32.vlgmr.msra.gmra.mrb[0].mxu0 %v85_v20  ;;  %v242_v12 = vrot.slane %v237_v11, %v241_v10  ;;  %p789_p8 = pnand %p788_p7, %p782_p4 }
  0x6f   :  { %197 = vmatprep.mubr.f32.mxu0 %v88_v22  ;;  %641 = vmatpush3.bf16.msra.mxu0 %v638_v50  ;;  %v246_v22 = vrot.slane %v237_v11, %v245_v18 }
  0x70   :  { %633 = vmatpush1.bf16.msra.mxu1 %v632_v29  ;;  %643 = vmatprep.subr.bf16.mxu0 %v642_v53 }
  0x71   :  { %635 = vmatprep.subr.bf16.mxu1 %v634_v32 }
  0x72   :  { %198 = vmatmul.mubr.f32.gmra.mrb[2].mxu0 %v87_v23 }
  0x73   :  { %645 = vmatpush3.bf16.msra.mxu0 %v642_v53 }
  0x74   :  { %637 = vmatpush1.bf16.msra.mxu1 %v636_v35  ;;  %647 = vmatprep.subr.bf16.mxu0 %v646_v56 }
  0x77   :  { %649 = vmatpush3.bf16.msra.mxu0 %v646_v56 }
  0x78   :  { %651 = vmatprep.subr.bf16.mxu0 %v650_v59 }
  0x7b   :  { %653 = vmatpush3.bf16.msra.mxu0 %v650_v59 }
  0x7c   :  { %655 = vmatprep.subr.bf16.mxu0 %v654_v62 }
  0x7f   :  { %657 = vmatpush3.bf16.msra.mxu0 %v654_v62 }
  0x80   :  { %659 = vmatprep.subr.bf16.mxu0 %v658_v1 }
  0x83   :  { %661 = vmatpush3.bf16.msra.mxu0 %v658_v1 }
  0x84   :  { %663 = vmatprep.subr.bf16.mxu0 %v662_v5 }
  0x87   :  { %665 = vmatpush3.bf16.msra.mxu0 %v662_v5 }
  0x88   :  { %667 = vmatprep.subr.bf16.mxu0 %v666_v7 }
  0x8b   :  { %669 = vmatpush3.bf16.msra.mxu0 %v666_v7 }
 0x141   :  { %v515_v37 = vpop.f32.mrb[0].mxu0 }
 0x142   :  { %v516_v39 = vpop.f32.mrb[1].mxu0 }
 0x143   :  { %v517_v40 = vadd.f32 %v516_v39, %v515_v37 }
 0x145   :  { %v195_v41 = vadd.f32 %v517_v40, %v479_v38  ;;  %v518_v42 = vpop.f32.mrb[2].mxu0 }
 0x146   :  { %v519_v43 = vpop.f32.mrb[3].mxu0 }
 0x147   :  { %v203_v44 = vmax.f32 %v195_v41, 0.0  ;;  %v520_v45 = vadd.f32 %v519_v43, %v518_v42 }
 0x149   :  { %440 = vst [vmem:[#allocation10] sm:$0xff] %v203_v44  ;;  %v200_v46 = vadd.f32 %v520_v45, %v479_v38  ;;  %314 = vmatmul.mubr.f32.vlgmr.msra.gmra.mrb[0].mxu1 %v203_v44 }
 0x14a   :  { %319 = vmatprep.mubr.f32.mxu1 %v843_v36 }
 0x14b   :  { %v204_v47 = vmax.f32 %v200_v46, 0.0 }
 0x14d   :  { %441 = vst [vmem:[#allocation10 + $0x8] sm:$0xff] %v204_v47  ;;  %320 = vmatmul.mubr.f32.gmra.mrb[2].mxu1 %v204_v47 }
 0x21c   :  { %v315_v13 = vpop.f32.mrb[0].mxu1 }
 0x21d   :  { %v316_v14 = vadd.f32 %v315_v13, %v242_v12  ;;  %v317_v15 = vpop.f32.mrb[1].mxu1 }
 0x21e   :  { %v318_v23 = vadd.f32 %v317_v15, %v246_v22 }
 0x21f   :  { %v480_v16 = vmul.f32 -1.442695, %v316_v14 }
 0x220   :  { %v321_v17 = vpop.f32.mrb[2].mxu1 }
 0x221   :  { %681 = vpow2.f32 %v480_v16  ;;  %v322_v19 = vadd.f32 %v321_v17, %v242_v12  ;;  %v323_v20 = vpop.f32.mrb[3].mxu1 }
 0x222   :  { %v324_v26 = vadd.f32 %v323_v20, %v246_v22 }
 0x223   :  { %v481_v21 = vmul.f32 -1.442695, %v322_v19 }
 0x225   :  { %683 = vpow2.f32 %v481_v21 }
 0x226   :  { %685 = vtanh.f32 %v318_v23 }
 0x22b   :  { %v682_v24 = vpop.eup %681 }
 0x22c   :  { %v332_v25 = vadd.f32 1.0, %v682_v24 }
 0x22e   :  { %687 = vrcp.f32 %v332_v25 }
 0x22f   :  { %v684_v27 = vpop.eup %683  ;;  %689 = vtanh.f32 %v324_v26 }
 0x230   :  { %v333_v28 = vadd.f32 1.0, %v684_v27  ;;  %v686_v29 = vpop.eup %685 }
 0x232   :  { %691 = vrcp.f32 %v333_v28 }
 0x238   :  { %v688_v30 = vpop.eup %687 }
 0x239   :  { %v340_v31 = vmul.f32 %v688_v30, %v686_v29  ;;  %v690_v32 = vpop.eup %689 }
 0x23b   :  { %571 = vmatprep.mubr.f32.mxu0 %v340_v31 }
 0x23c   :  { %v692_v33 = vpop.eup %691 }
 0x23d   :  { %v341_v34 = vmul.f32 %v692_v33, %v690_v32 }
 0x23f   :  { %572 = vmatmul.mubr.f32.vlgmr.msra.gmra.mrb[4].mxu0 %v341_v34 }
 0x240   :  { %792 = shalt.err (!%p789_p8)
}
 0x241   :  { %s793_s19 = scalar_lea.hbm %s998_s7, 256 }
 0x242   :  { %p794_p9 = scmp.ne.s32.totalorder %s998_s7, %s793_s19  ;;  %p797_p10 = scmp.lt.u32.totalorder %s793_s19, %s998_s7 }
 0x244   :  { %p799_p11 = pnand %p797_p10, %p794_p9 }
 0x246   :  { %802 = shalt.err (!%p799_p11)
}
 0x247   :  { %455 = dma.vmem_to_hbm [thread:$0]  %s450_s13, 256, %s998_s7, [#allocation4], %s836_s15, %s836_s15, %s837_s16  }
 0x248   :  { %v482_v35 = vld [vmem:[%s997_s6] ss:$0 sm:$0xff]  ;;  %s845_s27 = smov [#allocation11]  }
 0x249   :  { %s461_s29 = sshll.u32 %s845_s27, 4  ;;  %s462_s29 = int_to_ptr.vmem [resolvable:$true] %s461_s29 }
 0x24a   :  { %s803_s30 = scalar_lea.vmem %s462_s29, 256  ;;  %p808_p13 = scmp.lt.s32.totalorder %s462_s29, %s462_s29 }
 0x24b   :  { %p804_p12 = scmp.ne.s32.totalorder %s462_s29, %s803_s30  ;;  %p809_p0 = scmp.lt.s32.totalorder %s803_s30, %s803_s30 }
 0x24d   :  { %p810_p1 = por %p809_p0, %p808_p13 }
 0x24f   :  { %p811_p2 = pnand %p810_p1, %p804_p12 }
 0x312   :  { %v573_v36 = vpop.f32.mrb[4].mxu0 }
 0x313   :  { %v437_v37 = vadd.f32 %v573_v36, %v482_v35  ;;  %v431_v38 = vpop.f32.mrb[5].mxu0 }
 0x314   :  { %v432_v39 = vadd.f32 %v482_v35, %v431_v38 }
 0x315   :  { %443 = vst [vmem:[#allocation11 + $0x8] sm:$0xff] %v437_v37 }
 0x316   :  { %442 = vst [vmem:[#allocation11] sm:$0xff] %v432_v39 }
 0x317   :  { %814 = shalt.err (!%p811_p2)
}
 0x318   :  { %s815_s6 = scalar_lea.hbm %s999_s8, 256 }
 0x319   :  { %p816_p3 = scmp.ne.s32.totalorder %s999_s8, %s815_s6  ;;  %p819_p4 = scmp.lt.u32.totalorder %s815_s6, %s999_s8 }
 0x31b   :  { %p821_p5 = pnand %p819_p4, %p816_p3 }
 0x31d   :  { %824 = shalt.err (!%p821_p5)
}
 0x31e   :  { %467 = dma.vmem_to_hbm [thread:$0]  %s462_s29, 256, %s999_s8, [#allocation12], %s836_s15, %s836_s15, %s837_s16  }
 0x31f   :  { %831 = dma.done.wait [#allocation4], 256  }
 0x320   :  { %832 = vsyncadd [#allocation4], 4294967040 }
 0x321   :  { %833 = dma.done.wait [#allocation12], 256  }
 0x322   :  { %834 = vsyncadd [#allocation12], 4294967040 }
 0x323   :  { %474 = vsyncpa [#allocation3], 1 }
 0x324   :  { %475 = vsyncpa [#allocation6], 1 }
 0x325   :  { %476 = vsyncpa [#allocation9], 1 }
 0x326   :  { %477 = vsyncpa [#allocation4], 1 }
 0x327   :  { %478 = vsyncpa [#allocation12], 1 }

</bundles_post_ra>
